<compile_context>
chip_gen: v7x
topology: tpu7x:2x2x1
jax: 0.10.0
libtpu: 0.0.40
codegen_flags: <defaults>
</compile_context>

<pallas_src>
import functools

import jax
import jax.numpy as jnp
from jax.experimental import pallas as pl
from jax.experimental.pallas import tpu as pltpu


_LANE = 128
_TARGET_BLOCK_BYTES = 4 * 1024 * 1024     # per operand, per pipeline buffer
_MIN_GRID_STEPS = 4                       # even megacore sharding on v7x
_VMEM_LIMIT_BYTES = 32 * 1024 * 1024      # 3 arrays x 2 buffers x 4 MiB = 24 MiB + slack


def _linf_clip_kernel(x_ref, base_ref, o_ref, *, eps: float):
    # Pure VPU elementwise work on one (block_rows, 128) lane-dense tile.
    x = x_ref[...]
    b = base_ref[...]
    o_ref[...] = x + jnp.clip(b - x, -eps, eps)


def _sublane(dtype) -> int:
    # Native TPU tiling: (8,128) for 4-byte, (16,128) for 2-byte, (32,128) for 1-byte.
    return max(8, 32 // jnp.dtype(dtype).itemsize)


def linf_clip_pallas(x: jax.Array, base: jax.Array, eps: float = 16.0 / 255.0) -> jax.Array:
    """out = x + clip(base - x, -eps, eps), elementwise, any shape."""
    if x.shape != base.shape:
        raise ValueError(f"shape mismatch: {x.shape} vs {base.shape}")

    # Match torch type promotion (don't silently downcast the registered buffer).
    out_dtype = jnp.promote_types(x.dtype, base.dtype)
    x = x.astype(out_dtype)
    base = base.astype(out_dtype)

    orig_shape = x.shape
    total = x.size
    if total == 0:
        return x

    itemsize = jnp.dtype(out_dtype).itemsize
    sublane = _sublane(out_dtype)
    max_block_rows = max(
        sublane,
        (_TARGET_BLOCK_BYTES // (_LANE * itemsize)) // sublane * sublane,
    )

    xf = x.reshape(-1)
    bf = base.reshape(-1)

    # ---- lane-dense 2-D layout: (rows, 128) --------------------------------
    padded = (total % _LANE) != 0
    if padded:
        # Rare ragged case only: pad the flat array to the next lane multiple
        # (one extra copy).  The common ML case (size % 128 == 0) is a free
        # reshape with zero extra HBM traffic.
        rows = pl.cdiv(total, _LANE)
        pad = rows * _LANE - total
        xf = jnp.pad(xf, (0, pad))
        bf = jnp.pad(bf, (0, pad))
    else:
        rows = total // _LANE

    x2 = xf.reshape(rows, _LANE)
    b2 = bf.reshape(rows, _LANE)

    # ---- block / grid selection --------------------------------------------
    if rows <= sublane:
        # Tiny input: single block equal to the full array (legal even when
        # rows is not sublane-aligned, since the block equals the full dims).
        block_rows = rows
    else:
        # Aim for >= _MIN_GRID_STEPS grid steps (balanced across v7x's two
        # TensorCores) but cap the block at ~4 MiB/operand so double-buffered
        # VMEM stays ~24 MiB on every generation.
        target = pl.cdiv(rows, _MIN_GRID_STEPS)
        block_rows = min(max_block_rows, pl.cdiv(target, sublane) * sublane)
    grid_len = pl.cdiv(rows, block_rows)  # partial last block is masked by Pallas

    out2 = pl.pallas_call(
        functools.partial(_linf_clip_kernel, eps=float(eps)),
        out_shape=jax.ShapeDtypeStruct((rows, _LANE), out_dtype),
        grid=(grid_len,),
        in_specs=[
            pl.BlockSpec((block_rows, _LANE), lambda i: (i, 0)),
            pl.BlockSpec((block_rows, _LANE), lambda i: (i, 0)),
        ],
        out_specs=pl.BlockSpec((block_rows, _LANE), lambda i: (i, 0)),
        compiler_params=pltpu.CompilerParams(
            dimension_semantics=("parallel",),
            vmem_limit_bytes=_VMEM_LIMIT_BYTES,
        ),
        cost_estimate=pl.CostEstimate(
            flops=2 * total,
            transcendentals=0,
            bytes_accessed=3 * total * itemsize,
        ),
    )(x2, b2)

    out_flat = out2.reshape(-1)
    if padded:
        out_flat = out_flat[:total]
    return out_flat.reshape(orig_shape)


if __name__ == "__main__":
    key = jax.random.PRNGKey(0)
    kx, kb = jax.random.split(key)
    eps = 16.0 / 255.0

    # --- f32, lane-multiple size (fast path, multi-step grid) ---------------
    N, C, H, W = 2, 4, 16, 16
    x = jax.random.normal(kx, (N, C, H, W), dtype=jnp.float32)
    base = jax.random.normal(kb, (N, C, H, W), dtype=jnp.float32)
    y = jax.block_until_ready(linf_clip_pallas(x, base, eps))
    ref = x + jnp.clip(base - x, -eps, eps)
    assert y.shape == x.shape and y.dtype == x.dtype
    assert bool(jnp.allclose(y, ref, rtol=0.0, atol=1e-6)), "f32 mismatch"
    assert bool(jnp.max(jnp.abs(y - x)) <= eps + 1e-6)

    # --- bf16, single full-array block path ----------------------------------
    xb = x.astype(jnp.bfloat16)
    bb = base.astype(jnp.bfloat16)
    yb = jax.block_until_ready(linf_clip_pallas(xb, bb, eps))
    refb = xb + jnp.clip(bb - xb, -eps, eps)
    assert yb.dtype == jnp.bfloat16
    assert bool(jnp.allclose(yb.astype(jnp.float32), refb.astype(jnp.float32),
                             rtol=0.0, atol=1e-2)), "bf16 mismatch"

    # --- ragged size (non-multiple of 128 fallback path) ---------------------
    xr = jax.random.normal(kx, (3, 5, 7), dtype=jnp.float32)
    br = jax.random.normal(kb, (3, 5, 7), dtype=jnp.float32)
    yr = jax.block_until_ready(linf_clip_pallas(xr, br, eps))
    refr = xr + jnp.clip(br - xr, -eps, eps)
    assert bool(jnp.allclose(yr, refr, rtol=0.0, atol=1e-6)), "ragged mismatch"

    print("KERNEL_OK")
</pallas_src>

<mosaic_0001>
module attributes {stable_mosaic.version = 11 : i64} {
  func.func @_linf_clip_kernel(%arg0: i32, %arg1: memref<8x128xf32, #tpu.memory_space<vmem>>, %arg2: memref<8x128xf32, #tpu.memory_space<vmem>>, %arg3: memref<8x128xf32, #tpu.memory_space<vmem>>) attributes {dimension_semantics = [#tpu.dimension_semantics<parallel>], iteration_bounds = array<i64: 2>, scalar_prefetch = 0 : i64, scratch_operands = 0 : i64, tpu.core_type = #tpu.core_type<tc>, window_params = [{transform_indices = @transform_0, window_bounds = array<i64: 8, 128>}, {transform_indices = @transform_1, window_bounds = array<i64: 8, 128>}, {transform_indices = @transform_2, window_bounds = array<i64: 8, 128>}]} {
    %c0 = arith.constant 0 : index
    %c0_0 = arith.constant 0 : index
    %0 = vector.load %arg1[%c0, %c0_0] : memref<8x128xf32, #tpu.memory_space<vmem>>, vector<8x128xf32>
    %c0_1 = arith.constant 0 : index
    %c0_2 = arith.constant 0 : index
    %1 = vector.load %arg2[%c0_1, %c0_2] : memref<8x128xf32, #tpu.memory_space<vmem>>, vector<8x128xf32>
    %2 = arith.subf %1, %0 : vector<8x128xf32>
    %cst = arith.constant -6.274510e-02 : f32
    %cst_3 = arith.constant 6.274510e-02 : f32
    %3 = vector.broadcast %cst : f32 to vector<8x128xf32>
    %4 = arith.maximumf %3, %2 : vector<8x128xf32>
    %5 = vector.broadcast %cst_3 : f32 to vector<8x128xf32>
    %6 = arith.minimumf %5, %4 : vector<8x128xf32>
    %7 = arith.addf %0, %6 : vector<8x128xf32>
    %c0_4 = arith.constant 0 : index
    %c0_5 = arith.constant 0 : index
    %8 = vector.load %arg3[%c0_4, %c0_5] : memref<8x128xf32, #tpu.memory_space<vmem>>, vector<8x128xf32>
    tpu.vector_store %arg3[%c0_4, %c0_5], %7 {strides = array<i32>} : memref<8x128xf32, #tpu.memory_space<vmem>>, vector<8x128xf32>,
    return
  }
  func.func @transform_0(%arg0: i32) -> (i32, i32) {
    %c0_i32 = arith.constant 0 : i32
    %c0_i32_0 = arith.constant 0 : i32
    return %arg0, %c0_i32 : i32, i32
  }
  func.func @transform_1(%arg0: i32) -> (i32, i32) {
    %c0_i32 = arith.constant 0 : i32
    %c0_i32_0 = arith.constant 0 : i32
    return %arg0, %c0_i32 : i32, i32
  }
  func.func @transform_2(%arg0: i32) -> (i32, i32) {
    %c0_i32 = arith.constant 0 : i32
    %c0_i32_0 = arith.constant 0 : i32
    return %arg0, %c0_i32 : i32, i32
  }
}

</mosaic_0001>

<bundles_post_ra>
// kernel: tpu_custom_call.1
= control target key start
LH: loop header
LB: loop body
LE: loop exit
PB: predicated region body
PF: predicated region fallthrough
CT: control target
= control target key end

     0   :  { %7 = vsyncpa [#allocation3], 0  ;;  %s736_s0 = inlined_call_operand.hbm [shape: f32[16,128], index: 0, kind: input, shape index: {}]   ;;  %s737_s1 = inlined_call_operand.hbm [shape: f32[16,128], index: 1, kind: input, shape index: {}]   ;;  %s738_s2 = inlined_call_operand.hbm [shape: f32[16,128], index: 2, kind: output, shape index: {}]  }
   0x1   :  { %9 = vsyncpa [#allocation3 + $0x1], 0 }
   0x2   :  { %10 = vsyncpa [#allocation6], 0 }
   0x3   :  { %12 = vsyncpa [#allocation6 + $0x1], 0 }
   0x4   :  { %13 = vsyncpa [#allocation4], 0 }
   0x5   :  { %15 = vsyncpa [#allocation4 + $0x1], 0  ;;  %s527_s9 = smov 0   ;;  %s529_s10 = smov 0  }
   0x6   :  { %s531_s11 = smov 0   ;;  %s533_s12 = smov 0  }
   0x7 LB: > { %s548_s13 = sadd.s32 4294967295, %s507_s12   ;;  %s310_s14 = sadd.s32 4294967294, %s507_s12   ;;  %s507_s12 = sphi %s533_s12, %s757_s12   ;;  %s503_s11 = sphi %s531_s11, %s756_s11   ;;  %s499_s10 = sphi %s529_s10, %s755_s10   ;;  %s495_s9 = sphi %s527_s9, %s754_s9  }
   0x8   : > { %s552_s15 = sadd.s32 1, %s507_s12   ;;  %s28_s16 = sadd.s32 1, %s503_s11 }
   0x9   : > { %s25_s17 = ssub.s32 %s507_s12, %s552_s15  ;;  %p35_p0 = scmp.ne.s32.totalorder %s503_s11, %s499_s10 }
   0xa   : > { %p26_p1 = scmp.eq.s32.totalorder %s25_s17, 0  ;;  %p36_p2 = scmp.eq.s32.totalorder %s507_s12, 0 }
   0xb   : > { %p41_p3 = scmp.ne.s32.totalorder %s499_s10, %s495_s9  ;;  %p42_p4 = scmp.eq.s32.totalorder %s548_s13, 0 }
   0xc   : > { %s564_s18 = scalar_select %p26_p1, %s503_s11, %s28_s16  }
   0xd   : > { %p566_p5 = por %p36_p2, %p35_p0  ;;  %p570_p6 = por %p42_p4, %p41_p3 }
   0xe   : > { %p91_p7 = scmp.eq.s32.totalorder %s548_s13, 1  ;;  %p97_p8 = scmp.eq.s32.totalorder %s310_s14, 1 }
   0xf   : > { %s742_s20 = scalar_select %p570_p6, 1, 0 }
  0x10   : > { %p343_p10 = scmp.lt.s32.totalorder %s507_s12, 2  ;;  %p577_p11 = por %p91_p7, %p35_p0 }
  0x11   : > { %p581_p12 = por %p97_p8, %p41_p3  ;;  %s586_s23 = sand.u32 1, %s503_s11  }
  0x12   : > { %s743_s21 = scalar_select %p577_p11, 1, 0 }
  0x13   : > { %s744_s22 = scalar_select %p581_p12, 1, 0 }
  0x14   : > { %s314_s24 = sshll.u32 %s507_s12, 7  ;;  %s313_s25 = sshll.u32 %s586_s23, 3 }
  0x15   : > { %s595_s28 = scalar_lea.hbm %s736_s0, %s314_s24  ;;  %s121_s29 = scalar_lea.vmem [#allocation2], %s313_s25 }
  0x16   : > { %s128_s30 = sshll.u32 %s121_s29, 4  ;;  %p601_p13 = pnand %p343_p10, %p566_p5  ;;  %s605_s30 = int_to_ptr.vmem [resolvable:$true] %s128_s30 }
  0x17   : > { %s118_s4 = scalar_lea.sflag [#allocation3], %s586_s23  ;;  %s377_s5 = scalar_lea.hbm %s595_s28, 128 }
  0x18   : > { %p378_p2 = scmp.ne.s32.totalorder %s595_s28, %s377_s5  ;;  %p379_p3 = pneg %p601_p13 }
  0x19   : > { %s382_s8 = scalar_lea.hbm %s736_s0, 256  ;;  %p383_p5 = scmp.lt.u32.totalorder %s595_s28, %s736_s0 }
  0x1a   : > { %p380_p4 = pnand %p379_p3, %p378_p2  ;;  %p384_p8 = scmp.lt.u32.totalorder %s382_s8, %s377_s5 }
  0x1b   : > { %p386_p9 = scmp.lt.u32.totalorder %s377_s5, %s595_s28 }
  0x1c   : > { %p381_p7 = pneg %p380_p4  ;;  %p385_p10 = por %p384_p8, %p383_p5 }
  0x1e   : > { %p387_p0 = por %p386_p9, %p385_p10 }
  0x20   : > { %p388_p1 = pnand %p387_p0, %p381_p7 }
  0x22   : > { %391 = shalt.err (!%p388_p1)
}
  0x23   : > { %s392_s17 = scalar_lea.vmem %s605_s30, 128  ;;  %s509_s19 = smov [#allocation2]  }
  0x24   : > { %p393_p2 = scmp.ne.s32.totalorder %s605_s30, %s392_s17  ;;  %s397_s26 = sshll.u32 %s509_s19, 4  ;;  %s398_s26 = int_to_ptr.vmem [resolvable:$false] %s397_s26 }
  0x25   : > { %s399_s27 = scalar_lea.vmem %s398_s26, 256  ;;  %p400_p11 = scmp.lt.s32.totalorder %s605_s30, %s398_s26 }
  0x26   : > { %p395_p4 = pnand %p393_p2, %p379_p3  ;;  %p401_p5 = scmp.lt.s32.totalorder %s399_s27, %s392_s17 }
  0x28   : > { %p396_p12 = pneg %p395_p4  ;;  %p402_p8 = por %p401_p5, %p400_p11 }
  0x2a   : > { %p403_p9 = pnand %p402_p8, %p396_p12 }
  0x2c   : > { %406 = shalt.err (!%p403_p9)
}
  0x2d   : > { %335 = dma.hbm_to_vmem [thread:$0]  (!%p601_p13), %s595_s28, 128, %s605_s30, %s118_s4  }
  0x2e   : > { %p746_p0 = scmp.lt.s32.totalorder %s507_s12, 3  ;;  %p747_p1 = scmp.ge.s32.totalorder %s507_s12, 1 }
  0x2f   : > { %s648_s7 = scalar_lea.hbm %s737_s1, %s314_s24  ;;  %s139_s8 = scalar_lea.vmem [#allocation5], %s313_s25 }
  0x30   : > { %p639_p7 = pnand %p747_p1, %p746_p0  ;;  %s146_s14 = sshll.u32 %s139_s8, 4  ;;  %s147_s14 = int_to_ptr.vmem [resolvable:$true] %s146_s14 }
  0x31   : > { %s136_s28 = scalar_lea.sflag [#allocation6], %s586_s23  ;;  %s407_s30 = scalar_lea.hbm %s648_s7, 128 }
  0x32   : > { %s748_s29 = scalar_select %p639_p7, 1, 0 }
  0x33   : > { %p408_p11 = scmp.ne.s32.totalorder %s648_s7, %s407_s30  ;;  %s412_s24 = scalar_lea.hbm %s737_s1, 256 }
  0x34   : > { %p413_p2 = scmp.lt.u32.totalorder %s648_s7, %s737_s1  ;;  %p414_p4 = scmp.lt.u32.totalorder %s412_s24, %s407_s30 }
  0x35   : > { %p410_p12 = pnand %p408_p11, %p379_p3  ;;  %p416_p8 = scmp.lt.u32.totalorder %s407_s30, %s648_s7 }
  0x36   : > { %p415_p5 = por %p414_p4, %p413_p2 }
  0x37   : > { %p411_p10 = pneg %p410_p12 }
  0x38   : > { %p417_p9 = por %p416_p8, %p415_p5 }
  0x3a   : > { %p418_p0 = pnand %p417_p9, %p411_p10 }
  0x3c   : > { %421 = shalt.err (!%p418_p0)
}
  0x3d   : > { %s422_s23 = scalar_lea.vmem %s147_s14, 128  ;;  %s510_s25 = smov [#allocation5]  }
  0x3e   : > { %p423_p1 = scmp.ne.s32.totalorder %s147_s14, %s422_s23  ;;  %s427_s26 = sshll.u32 %s510_s25, 4  ;;  %s428_s26 = int_to_ptr.vmem [resolvable:$false] %s427_s26 }
  0x3f   : > { %s429_s27 = scalar_lea.vmem %s428_s26, 256  ;;  %p430_p6 = scmp.lt.s32.totalorder %s147_s14, %s428_s26 }
  0x40   : > { %p425_p11 = pnand %p423_p1, %p379_p3  ;;  %p431_p7 = scmp.lt.s32.totalorder %s429_s27, %s422_s23 }
  0x42   : > { %p426_p12 = pneg %p425_p11  ;;  %p432_p2 = por %p431_p7, %p430_p6 }
  0x44   : > { %p433_p4 = pnand %p432_p2, %p426_p12 }
  0x46   : > { %436 = shalt.err (!%p433_p4)
}
  0x47   : > { %338 = dma.hbm_to_vmem [thread:$0]  (!%p601_p13), %s648_s7, 128, %s147_s14, %s136_s28  }
  0x48   : > { %p749_p10 = scmp.ne.s32.totalorder %s748_s29, 0 }
  0x49   : > { %s675_s5 = sand.u32 (!%p749_p10), 1, %s499_s10   ;;  %p750_p3 = scmp.ne.s32.totalorder (!%p749_p10), %s742_s20, 0 }
  0x4a   : > { %155 = sbr.rel (%p749_p10) target bundleno = 110 (0x6e), region = 28  ;;  %s318_s6 = sshll.u32 (!%p749_p10), %s675_s5, 3 }
  0x4b   : > { %s158_s8 = scalar_lea.sflag (!%p749_p10), [#allocation3], %s675_s5  ;;  %s161_s30 = scalar_lea.vmem (!%p749_p10), [#allocation2], %s318_s6 }
  0x51   : > { %482 = dma.done.wait (%p750_p3), %s158_s8, 128  }
  0x52   : > { %484 = vsyncadd (%p750_p3), %s158_s8, 4294967168  ;;  %s167_s3 = scalar_lea.sflag [#allocation6], %s675_s5  ;;  %s170_s7 = scalar_lea.vmem [#allocation5], %s318_s6 }
  0x53   : > { %486 = dma.done.wait (%p750_p3), %s167_s3, 128  }
  0x54   : > { %488 = vsyncadd (%p750_p3), %s167_s3, 4294967168  ;;  %v196_v0 = vld [vmem:[%s161_s30] sm:$0xff]  ;;  %v197_v1 = vld [vmem:[%s170_s7] sm:$0xff]  ;;  %s195_s29 = scalar_lea.vmem [#allocation7], %s318_s6  ;;  %s323_s28 = sshll.u32 %s548_s13, 7 }
  0x55   : > { %v198_v2 = vsub.f32 %v197_v1, %v196_v0  ;;  %s217_s14 = sshll.u32 %s195_s29, 4  ;;  %s694_s20 = scalar_lea.hbm %s738_s2, %s323_s28  ;;  %s689_s14 = int_to_ptr.vmem [resolvable:$true] %s217_s14 }
  0x56   : > { %s204_s24 = scalar_lea.sflag [#allocation4], %s675_s5  ;;  %s437_s17 = scalar_lea.vmem %s689_s14, 128 }
  0x57   : > { %v321_v3 = vclamps-f32 %v198_v2, 0.0627451  ;;  %p438_p6 = scmp.ne.s32.totalorder %s689_s14, %s437_s17  ;;  %p751_p13 = scmp.ne.s32.totalorder %s743_s21, 0 }
  0x58   : > { %s511_s13 = smov [#allocation7]  }
  0x59   : > { %v201_v4 = vadd.f32 %v321_v3, %v196_v0  ;;  %p439_p7 = pnand %p438_p6, %p751_p13  ;;  %s441_s19 = sshll.u32 %s511_s13, 4  ;;  %s442_s19 = int_to_ptr.vmem [resolvable:$false] %s441_s19 }
  0x5a   : > { %s443_s23 = scalar_lea.vmem %s442_s19, 256  ;;  %p444_p8 = scmp.lt.s32.totalorder %s689_s14, %s442_s19 }
  0x5b   : > { %202 = vst [vmem:[%s195_s29] sm:$0xff] %v201_v4  ;;  %p440_p5 = pneg %p439_p7  ;;  %p445_p9 = scmp.lt.s32.totalorder %s443_s23, %s437_s17 }
  0x5d   : > { %p446_p0 = por %p445_p9, %p444_p8 }
  0x5f   : > { %p447_p1 = pnand %p446_p0, %p440_p5 }
  0x61   : > { %450 = shalt.err (!%p447_p1)
}
  0x62   : > { %s451_s25 = scalar_lea.hbm %s694_s20, 128  ;;  %s455_s5 = scalar_lea.hbm %s738_s2, 256 }
  0x63   : > { %p452_p11 = scmp.ne.s32.totalorder %s694_s20, %s451_s25  ;;  %p456_p4 = scmp.lt.u32.totalorder %s694_s20, %s738_s2 }
  0x64   : > { %p457_p10 = scmp.lt.u32.totalorder %s455_s5, %s451_s25  ;;  %p459_p6 = scmp.lt.u32.totalorder %s451_s25, %s694_s20 }
  0x65   : > { %p453_p12 = pnand %p452_p11, %p751_p13 }
  0x66   : > { %p458_p3 = por %p457_p10, %p456_p4 }
  0x67   : > { %p454_p2 = pneg %p453_p12 }
  0x68   : > { %p460_p7 = por %p459_p6, %p458_p3 }
  0x6a   : > { %p461_p5 = pnand %p460_p7, %p454_p2 }
  0x6c   : > { %464 = shalt.err (!%p461_p5)
}
  0x6d   : > { %330 = dma.vmem_to_hbm [thread:$0]  (%p751_p13), %s689_s14, 128, %s694_s20, %s204_s24  }
  0x6e PF: > { %s229_s30 = sand.u32 1, %s495_s9   ;;  %p752_p8 = scmp.ne.s32.totalorder %s744_s22, 0 }
  0x6f   : > { %p753_p9 = scmp.ge.s32.totalorder %s507_s12, 2  ;;  %s230_s3 = scalar_lea.sflag [#allocation4], %s229_s30 }
  0x71   : > { %p340_p0 = pnand %p753_p9, %p752_p8 }
  0x73   : > { %490 = dma.done.wait (!%p340_p0), %s230_s3, 128  }
  0x74   : > { %492 = vsyncadd (!%p340_p0), %s230_s3, 4294967168  ;;  %p18_p1 = scmp.ge.s32.totalorder %s552_s15, 4   ;;  %s754_s9 = smov %s499_s10 }
  0x75   : > { %s755_s10 = smov %s503_s11  ;;  %s756_s11 = smov %s564_s18 }
  0x76   : > { %s757_s12 = smov %s552_s15  ;;  %20 = sbr.rel (!%p18_p1) target bundleno = 7 (0x7), region = 86 }
  0x7d   :  { %235 = vsyncpa [#allocation3], 1 }
  0x7e   :  { %237 = vsyncpa [#allocation3 + $0x1], 1 }
  0x7f   :  { %238 = vsyncpa [#allocation6], 1 }
  0x80   :  { %240 = vsyncpa [#allocation6 + $0x1], 1 }
  0x81   :  { %241 = vsyncpa [#allocation4], 1 }
  0x82   :  { %243 = vsyncpa [#allocation4 + $0x1], 1 }

</bundles_post_ra>
